<compile_context>
chip_gen: v6e
topology: v6e:2x2x1
jax: 0.10.0
libtpu: 0.0.40
codegen_flags: <defaults>
</compile_context>

<pallas_src>
import numpy as np
import jax
import jax.numpy as jnp
from jax.experimental import pallas as pl
from jax.experimental.pallas import tpu as pltpu

NEGATIVE_SLOPE = 0.1   # folded away in-kernel: leaky_relu(x)!=0 <=> x!=0
STRIDE = 4
PAD = 1
KH = KW = 3
KP = STRIDE            # padded 4x4 tap grid == stride -> scatter is a reshape
CIN = 8
COUT = 16
CK = KP * KP * COUT    # 256 -> lane-dense (2 full vregs)


# ----------------------------- fused Pallas kernel ---------------------------

def _fused_kernel(x_ref, w_ref, b_ref, o_ref):
    # core = bias-free transposed-conv taps: (tm, Cin) @ (Cin, KP*KP*Cout) on MXU.
    core = jnp.dot(x_ref[...], w_ref[...], preferred_element_type=jnp.float32)
    b = b_ref[...]                                   # (1, CK) tap-tiled bias
    # x8 = conv_t(x1) = core + b ;  x11 = leaky_relu(x8) is nonzero iff x8 is.
    # x12 = -x3 = -(conv_t(-x1)) = core - b.
    # TODO(synk): original torch graph uses a float tensor as the where-condition
    # and a non-broadcastable (1,32,16,16) fill (it errors at runtime); here the
    # condition is (x11 != 0) and the fill is the scalar -0.1, matching the JAX
    # reference below exactly.
    o_ref[...] = jnp.where(core + b != 0.0, core - b, jnp.float32(-0.1))


# --------------------------------- wrappers -----------------------------------

def prepare_params(weight, bias):
    """Run once: pad 3x3 taps to the 4x4 (=stride) grid and flatten; tile bias."""
    cin, cout = weight.shape[0], weight.shape[1]
    w4 = jnp.zeros((cin, KP, KP, cout), jnp.float32)
    w4 = w4.at[:, :KH, :KW, :].set(
        jnp.transpose(weight, (0, 2, 3, 1)).astype(jnp.float32))
    w_flat = w4.reshape(cin, KP * KP * cout)                       # (Cin, CK)
    b_tiled = jnp.tile(bias.astype(jnp.float32), KP * KP).reshape(1, KP * KP * cout)
    return w_flat, b_tiled


@jax.jit
def model_forward(x1_nchw, w_flat, b_tiled):
    N, Cin, Hin, Win = x1_nchw.shape
    ck = w_flat.shape[1]
    Cout = ck // (KP * KP)

    x_nhwc = jnp.transpose(x1_nchw, (0, 2, 3, 1)).astype(jnp.float32)
    M = N * Hin * Win
    x_flat = x_nhwc.reshape(M, Cin)

    # Big, sublane-aligned M tiles: amortize per-step overhead, stay HBM-bound.
    tm = min(M, 2048)
    tm = ((tm + 7) // 8) * 8
    Mp = ((M + tm - 1) // tm) * tm
    if Mp != M:
        x_flat = jnp.pad(x_flat, ((0, Mp - M), (0, 0)))

    cost = pl.CostEstimate(
        flops=2 * Mp * Cin * ck + 4 * Mp * ck,
        transcendentals=0,
        bytes_accessed=(Mp * Cin + Cin * ck + ck + Mp * ck) * 4)

    out_flat = pl.pallas_call(
        _fused_kernel,
        out_shape=jax.ShapeDtypeStruct((Mp, ck), jnp.float32),
        grid=(Mp // tm,),
        in_specs=[pl.BlockSpec((tm, Cin), lambda i: (i, 0)),
                  pl.BlockSpec((Cin, ck), lambda i: (0, 0)),
                  pl.BlockSpec((1, ck), lambda i: (0, 0))],
        out_specs=pl.BlockSpec((tm, ck), lambda i: (i, 0)),
        compiler_params=pltpu.CompilerParams(
            dimension_semantics=("parallel",)),     # no accumulator across steps
        cost_estimate=cost,
    )(x_flat, w_flat, b_tiled)

    # Padded rows (Mp != M) hold where(b!=0, -b, -0.1) garbage; the [:M] crop
    # below removes them — keep the crop.
    taps = out_flat[:M].reshape(N, Hin, Win, KP, KP, Cout)
    # Single combined transpose straight to NCHW-full, then crop.
    full_nchw = jnp.transpose(taps, (0, 5, 1, 3, 2, 4)).reshape(
        N, Cout, Hin * KP, Win * KP)

    Hout = (Hin - 1) * STRIDE - 2 * PAD + KH
    Wout = (Win - 1) * STRIDE - 2 * PAD + KW
    return full_nchw[:, :, PAD:PAD + Hout, PAD:PAD + Wout]


# ----------------------------- pure-JAX reference -----------------------------

def torch_like_reference(x1_nchw, weight, bias):
    def conv_t(x):
        w = jnp.transpose(jnp.flip(weight, (2, 3)), (1, 0, 2, 3))   # OIHW
        y = jax.lax.conv_general_dilated(
            x, w, window_strides=(1, 1),
            padding=[(KH - 1 - PAD, KH - 1 - PAD), (KW - 1 - PAD, KW - 1 - PAD)],
            lhs_dilation=(STRIDE, STRIDE),
            dimension_numbers=('NCHW', 'OIHW', 'NCHW'))
        return y + bias[None, :, None, None]

    x2 = -x1_nchw
    x3 = conv_t(x2)
    x7 = -x2
    x8 = conv_t(x7)
    x11 = jnp.where(x8 > 0, x8, x8 * NEGATIVE_SLOPE)
    x12 = -x3
    return jnp.where(x11 != 0, x12, jnp.float32(-0.1))


if __name__ == "__main__":
    key = jax.random.PRNGKey(0)
    kx, kw, kb = jax.random.split(key, 3)

    N, Hin, Win = 1, 16, 16                          # small spatial; Cin fixed by module
    x1 = jax.random.normal(kx, (N, CIN, Hin, Win), jnp.float32)

    # Deterministic ConvTranspose2d(8, 16, 3) parameters (PyTorch-style uniform bound).
    bound = 1.0 / np.sqrt(COUT * KH * KW)
    weight = jax.random.uniform(kw, (CIN, COUT, KH, KW), jnp.float32, -bound, bound)
    bias = jax.random.uniform(kb, (COUT,), jnp.float32, -bound, bound)

    w_flat, b_tiled = prepare_params(weight, bias)   # hoisted: done once at init

    out = jax.block_until_ready(model_forward(x1, w_flat, b_tiled))
    ref = jax.block_until_ready(torch_like_reference(x1, weight, bias))

    assert out.shape == ref.shape, (out.shape, ref.shape)
    np.testing.assert_allclose(np.asarray(out), np.asarray(ref), rtol=1e-4, atol=1e-4)
    print("KERNEL_OK")
</pallas_src>

<mosaic_0001>
module attributes {stable_mosaic.version = 11 : i64} {
  func.func @_fused_kernel(%arg0: i32, %arg1: memref<256x8xf32, #tpu.memory_space<vmem>>, %arg2: memref<8x256xf32, #tpu.memory_space<vmem>>, %arg3: memref<1x256xf32, #tpu.memory_space<vmem>>, %arg4: memref<256x256xf32, #tpu.memory_space<vmem>>) attributes {dimension_semantics = [#tpu.dimension_semantics<parallel>], iteration_bounds = array<i64: 1>, scalar_prefetch = 0 : i64, scratch_operands = 0 : i64, tpu.core_type = #tpu.core_type<tc>, window_params = [{transform_indices = @transform_0, window_bounds = array<i64: 256, 8>}, {pipeline_mode = #tpu.pipeline_mode<synchronous>, transform_indices = @transform_1, window_bounds = array<i64: 8, 256>}, {pipeline_mode = #tpu.pipeline_mode<synchronous>, transform_indices = @transform_2, window_bounds = array<i64: 1, 256>}, {transform_indices = @transform_3, window_bounds = array<i64: 256, 256>}]} {
    %c0 = arith.constant 0 : index
    %c0_0 = arith.constant 0 : index
    %0 = vector.load %arg1[%c0, %c0_0] : memref<256x8xf32, #tpu.memory_space<vmem>>, vector<256x8xf32>
    %c0_1 = arith.constant 0 : index
    %c0_2 = arith.constant 0 : index
    %1 = vector.load %arg2[%c0_1, %c0_2] : memref<8x256xf32, #tpu.memory_space<vmem>>, vector<8x256xf32>
    %cst = arith.constant dense<0.000000e+00> : vector<256x256xf32>
    %2 = tpu.matmul %0, %1, %cst {dimension_numbers = #tpu.dot_dimension_numbers<[1], [0], [0], [1], [0, 0, 1, 1], [], []>} : vector<256x8xf32>, vector<8x256xf32>, vector<256x256xf32> -> vector<256x256xf32>
    %c0_3 = arith.constant 0 : index
    %c0_4 = arith.constant 0 : index
    %3 = vector.load %arg3[%c0_3, %c0_4] : memref<1x256xf32, #tpu.memory_space<vmem>>, vector<1x256xf32>
    %4 = vector.broadcast %3 : vector<1x256xf32> to vector<256x256xf32>
    %5 = arith.addf %2, %4 : vector<256x256xf32>
    %cst_5 = arith.constant 0.000000e+00 : f32
    %6 = vector.broadcast %cst_5 : f32 to vector<256x256xf32>
    %7 = arith.cmpf one, %5, %6 : vector<256x256xf32>
    %8 = vector.broadcast %3 : vector<1x256xf32> to vector<256x256xf32>
    %9 = arith.subf %2, %8 : vector<256x256xf32>
    %cst_6 = arith.constant -1.000000e-01 : f32
    %10 = vector.broadcast %cst_6 : f32 to vector<256x256xf32>
    %11 = arith.select %7, %9, %10 : vector<256x256xi1>, vector<256x256xf32>
    %c0_7 = arith.constant 0 : index
    %c0_8 = arith.constant 0 : index
    %12 = vector.load %arg4[%c0_7, %c0_8] : memref<256x256xf32, #tpu.memory_space<vmem>>, vector<256x256xf32>
    tpu.vector_store %arg4[%c0_7, %c0_8], %11 {strides = array<i32>} : memref<256x256xf32, #tpu.memory_space<vmem>>, vector<256x256xf32>,
    return
  }
  func.func @transform_0(%arg0: i32) -> (i32, i32) {
    %c0_i32 = arith.constant 0 : i32
    %c0_i32_0 = arith.constant 0 : i32
    return %arg0, %c0_i32 : i32, i32
  }
  func.func @transform_1(%arg0: i32) -> (i32, i32) {
    %c0_i32 = arith.constant 0 : i32
    %c0_i32_0 = arith.constant 0 : i32
    %c0_i32_1 = arith.constant 0 : i32
    return %c0_i32, %c0_i32_0 : i32, i32
  }
  func.func @transform_2(%arg0: i32) -> (i32, i32) {
    %c0_i32 = arith.constant 0 : i32
    %c0_i32_0 = arith.constant 0 : i32
    %c0_i32_1 = arith.constant 0 : i32
    return %c0_i32, %c0_i32_0 : i32, i32
  }
  func.func @transform_3(%arg0: i32) -> (i32, i32) {
    %c0_i32 = arith.constant 0 : i32
    %c0_i32_0 = arith.constant 0 : i32
    return %arg0, %c0_i32 : i32, i32
  }
}

</mosaic_0001>

<bundles_post_ra>
// kernel: model_forward.1
= control target key start
LH: loop header
LB: loop body
LE: loop exit
PB: predicated region body
PF: predicated region fallthrough
CT: control target
= control target key end

     0   :  { %8 = vsyncpa [#allocation3], 0  ;;  %s1358_s0 = inlined_call_operand.vmem [shape: f32[256,8], index: 0, kind: input, shape index: {}]   ;;  %s1359_s1 = inlined_call_operand.hbm [shape: f32[8,256], index: 1, kind: input, shape index: {}]   ;;  %s1360_s2 = inlined_call_operand.hbm [shape: f32[1,256], index: 2, kind: input, shape index: {}]   ;;  %s1361_s3 = inlined_call_operand.vmem [shape: f32[256,256], index: 3, kind: output, shape index: {}]  }
   0x1   :  { %9 = vsyncpa [#allocation5], 0  ;;  %s845_s12 = smov [#allocation2]   ;;  %s846_s14 = smov [#allocation4]  }
   0x2   :  { %s18_s13 = sshll.u32 %s845_s12, 4  ;;  %s28_s15 = sshll.u32 %s846_s14, 4  ;;  %s19_s13 = int_to_ptr.vmem [resolvable:$true] %s18_s13  ;;  %s29_s15 = int_to_ptr.vmem [resolvable:$true] %s28_s15 }
   0x3   :  { %s809_s16 = scalar_lea.vmem %s19_s13, 256  ;;  %p814_p1 = scmp.lt.s32.totalorder %s19_s13, %s19_s13 }
   0x4   :  { %p810_p0 = scmp.ne.s32.totalorder %s19_s13, %s809_s16  ;;  %p815_p2 = scmp.lt.s32.totalorder %s809_s16, %s809_s16 }
   0x6   :  { %p816_p3 = por %p815_p2, %p814_p1 }
   0x8   :  { %p817_p4 = pnand %p816_p3, %p810_p0 }
   0xa   :  { %820 = shalt.err (!%p817_p4)
}
   0xb   :  { %21 = dma.hbm_to_vmem [thread:$0]  %s1359_s1, 256, %s19_s13, [#allocation3]  }
   0xc   :  { %s829_s19 = scalar_lea.vmem %s29_s15, 32  ;;  %p834_p6 = scmp.lt.s32.totalorder %s29_s15, %s29_s15 }
   0xd   :  { %p830_p5 = scmp.ne.s32.totalorder %s29_s15, %s829_s19  ;;  %p835_p7 = scmp.lt.s32.totalorder %s829_s19, %s829_s19 }
   0xf   :  { %p836_p8 = por %p835_p7, %p834_p6 }
  0x11   :  { %p837_p9 = pnand %p836_p8, %p830_p5 }
  0x13   :  { %840 = shalt.err (!%p837_p9)
}
  0x14   :  { %31 = dma.hbm_to_vmem [thread:$0]  %s1360_s2, 32, %s29_s15, [#allocation5]  }
  0x15   :  { %841 = dma.done.wait [#allocation3], 256  }
  0x16   :  { %842 = vsyncadd [#allocation3], 4294967040 }
  0x17   :  { %843 = dma.done.wait [#allocation5], 32  }
  0x18   :  { %844 = vsyncadd [#allocation5], 4294967264  ;;  %v847_v0 = vmov 0.0   ;;  %v71_v1 = vld [vmem:[#allocation2 + $0x8] sm:$0xff]  ;;  %v70_v2 = vld [vmem:[#allocation2] sm:$0xff]  ;;  %vm72_vm0 = vcmask 64512   ;;  %v428_v35 = vlaneseq }
  0x19   :  { %233 = vmatprep.mubr.f32.mxu0 %v847_v0  ;;  %329 = vmatprep.mubr.f32.mxu1 %v847_v0  ;;  %v38_v3 = vld [vmem:[%s1358_s0] sm:$0xff]  ;;  %v39_v5 = vld [vmem:[%s1358_s0 + $0x8] sm:$0xff]  ;;  %v40_v7 = vld [vmem:[%s1358_s0 + $0x10] sm:$0xff] }
  0x1a   :  { %199 = vmatprep.subr.mxu0 %v71_v1  ;;  %796 = vmatprep.subr.mxu1 %v71_v1  ;;  %v54_v4 = vld [vmem:[%s1358_s0 + $0x80] sm:$0xff]  ;;  %v55_v6 = vld [vmem:[%s1358_s0 + $0x88] sm:$0xff]  ;;  %v56_v8 = vld [vmem:[%s1358_s0 + $0x90] sm:$0xff]  ;;  %v429_v36 = vshrl.u32 %v428_v35, 7 }
  0x1b   :  { %200 = vmatpush1.msra.mxu0 %v70_v2  ;;  %797 = vmatpush1.msra.mxu1 %v70_v2  ;;  %v41_v9 = vld [vmem:[%s1358_s0 + $0x18] sm:$0xff]  ;;  %v42_v11 = vld [vmem:[%s1358_s0 + $0x20] sm:$0xff]  ;;  %v43_v13 = vld [vmem:[%s1358_s0 + $0x28] sm:$0xff] }
  0x1c   :  { %764 = vmatmul.mubr.msk.f32.vlgmr.msra.gmra.mxu0 %vm72_vm0, %v38_v3  ;;  %780 = vmatmul.mubr.msk.f32.vlgmr.msra.gmra.mxu1 %vm72_vm0, %v54_v4  ;;  %v57_v10 = vld [vmem:[%s1358_s0 + $0x98] sm:$0xff]  ;;  %v58_v12 = vld [vmem:[%s1358_s0 + $0xa0] sm:$0xff]  ;;  %v59_v14 = vld [vmem:[%s1358_s0 + $0xa8] sm:$0xff]  ;;  %v430_v37 = vsub.s32 0, %v429_v36  ;;  %v434_v39 = vsub.s32 1, %v429_v36 }
  0x1d   :  { %239 = vmatprep.mubr.f32.mxu0 %v847_v0  ;;  %335 = vmatprep.mubr.f32.mxu1 %v847_v0  ;;  %v44_v15 = vld [vmem:[%s1358_s0 + $0x30] sm:$0xff]  ;;  %v45_v17 = vld [vmem:[%s1358_s0 + $0x38] sm:$0xff]  ;;  %v46_v19 = vld [vmem:[%s1358_s0 + $0x40] sm:$0xff] }
  0x1e   :  { %v60_v16 = vld [vmem:[%s1358_s0 + $0xb0] sm:$0xff]  ;;  %v61_v18 = vld [vmem:[%s1358_s0 + $0xb8] sm:$0xff]  ;;  %v62_v20 = vld [vmem:[%s1358_s0 + $0xc0] sm:$0xff] }
  0x1f   :  { %v47_v21 = vld [vmem:[%s1358_s0 + $0x48] sm:$0xff]  ;;  %v48_v23 = vld [vmem:[%s1358_s0 + $0x50] sm:$0xff]  ;;  %v49_v25 = vld [vmem:[%s1358_s0 + $0x58] sm:$0xff] }
  0x20   :  { %765 = vmatmul.mubr.msk.f32.gmra.mxu0 %vm72_vm0, %v39_v5  ;;  %781 = vmatmul.mubr.msk.f32.gmra.mxu1 %vm72_vm0, %v55_v6  ;;  %v63_v22 = vld [vmem:[%s1358_s0 + $0xc8] sm:$0xff]  ;;  %v64_v24 = vld [vmem:[%s1358_s0 + $0xd0] sm:$0xff]  ;;  %v65_v26 = vld [vmem:[%s1358_s0 + $0xd8] sm:$0xff] }
  0x21   :  { %245 = vmatprep.mubr.f32.mxu0 %v847_v0  ;;  %341 = vmatprep.mubr.f32.mxu1 %v847_v0  ;;  %v50_v27 = vld [vmem:[%s1358_s0 + $0x60] sm:$0xff]  ;;  %v51_v29 = vld [vmem:[%s1358_s0 + $0x68] sm:$0xff]  ;;  %v52_v31 = vld [vmem:[%s1358_s0 + $0x70] sm:$0xff] }
  0x22   :  { %v66_v28 = vld [vmem:[%s1358_s0 + $0xe0] sm:$0xff]  ;;  %v67_v30 = vld [vmem:[%s1358_s0 + $0xe8] sm:$0xff]  ;;  %v68_v32 = vld [vmem:[%s1358_s0 + $0xf0] sm:$0xff] }
  0x23   :  { %v53_v33 = vld [vmem:[%s1358_s0 + $0x78] sm:$0xff]  ;;  %v426_v38 = vld [vmem:[#allocation4] sm:$0x3] }
  0x24   :  { %766 = vmatmul.mubr.msk.f32.gmra.mxu0 %vm72_vm0, %v40_v7  ;;  %782 = vmatmul.mubr.msk.f32.gmra.mxu1 %vm72_vm0, %v56_v8  ;;  %v69_v34 = vld [vmem:[%s1358_s0 + $0xf8] sm:$0xff]  ;;  %v1034_v40 = vrot.slane %v426_v38, %v430_v37  ;;  %v1036_v41 = vrot.slane %v426_v38, %v434_v39 }
  0x25   :  { %251 = vmatprep.mubr.f32.mxu0 %v847_v0  ;;  %347 = vmatprep.mubr.f32.mxu1 %v847_v0 }
  0x28   :  { %767 = vmatmul.mubr.msk.f32.gmra.mxu0 %vm72_vm0, %v41_v9  ;;  %783 = vmatmul.mubr.msk.f32.gmra.mxu1 %vm72_vm0, %v57_v10 }
  0x29   :  { %257 = vmatprep.mubr.f32.mxu0 %v847_v0  ;;  %353 = vmatprep.mubr.f32.mxu1 %v847_v0 }
  0x2c   :  { %768 = vmatmul.mubr.msk.f32.gmra.mxu0 %vm72_vm0, %v42_v11  ;;  %784 = vmatmul.mubr.msk.f32.gmra.mxu1 %vm72_vm0, %v58_v12 }
  0x2d   :  { %263 = vmatprep.mubr.f32.mxu0 %v847_v0  ;;  %359 = vmatprep.mubr.f32.mxu1 %v847_v0 }
  0x30   :  { %769 = vmatmul.mubr.msk.f32.gmra.mxu0 %vm72_vm0, %v43_v13  ;;  %785 = vmatmul.mubr.msk.f32.gmra.mxu1 %vm72_vm0, %v59_v14 }
  0x31   :  { %269 = vmatprep.mubr.f32.mxu0 %v847_v0  ;;  %365 = vmatprep.mubr.f32.mxu1 %v847_v0 }
  0x34   :  { %770 = vmatmul.mubr.msk.f32.gmra.mxu0 %vm72_vm0, %v44_v15  ;;  %786 = vmatmul.mubr.msk.f32.gmra.mxu1 %vm72_vm0, %v60_v16 }
  0x35   :  { %275 = vmatprep.mubr.f32.mxu0 %v847_v0  ;;  %371 = vmatprep.mubr.f32.mxu1 %v847_v0 }
  0x38   :  { %771 = vmatmul.mubr.msk.f32.gmra.mxu0 %vm72_vm0, %v45_v17  ;;  %787 = vmatmul.mubr.msk.f32.gmra.mxu1 %vm72_vm0, %v61_v18 }
  0x39   :  { %281 = vmatprep.mubr.f32.mxu0 %v847_v0  ;;  %377 = vmatprep.mubr.f32.mxu1 %v847_v0 }
  0x3c   :  { %772 = vmatmul.mubr.msk.f32.gmra.mxu0 %vm72_vm0, %v46_v19  ;;  %788 = vmatmul.mubr.msk.f32.gmra.mxu1 %vm72_vm0, %v62_v20 }
  0x3d   :  { %287 = vmatprep.mubr.f32.mxu0 %v847_v0  ;;  %383 = vmatprep.mubr.f32.mxu1 %v847_v0 }
  0x40   :  { %773 = vmatmul.mubr.msk.f32.gmra.mxu0 %vm72_vm0, %v47_v21  ;;  %789 = vmatmul.mubr.msk.f32.gmra.mxu1 %vm72_vm0, %v63_v22 }
  0x41   :  { %293 = vmatprep.mubr.f32.mxu0 %v847_v0  ;;  %389 = vmatprep.mubr.f32.mxu1 %v847_v0 }
  0x44   :  { %774 = vmatmul.mubr.msk.f32.gmra.mxu0 %vm72_vm0, %v48_v23  ;;  %790 = vmatmul.mubr.msk.f32.gmra.mxu1 %vm72_vm0, %v64_v24 }
  0x45   :  { %299 = vmatprep.mubr.f32.mxu0 %v847_v0  ;;  %395 = vmatprep.mubr.f32.mxu1 %v847_v0 }
  0x48   :  { %775 = vmatmul.mubr.msk.f32.gmra.mxu0 %vm72_vm0, %v49_v25  ;;  %791 = vmatmul.mubr.msk.f32.gmra.mxu1 %vm72_vm0, %v65_v26 }
  0x49   :  { %305 = vmatprep.mubr.f32.mxu0 %v847_v0  ;;  %401 = vmatprep.mubr.f32.mxu1 %v847_v0 }
  0x4c   :  { %776 = vmatmul.mubr.msk.f32.gmra.mxu0 %vm72_vm0, %v50_v27  ;;  %792 = vmatmul.mubr.msk.f32.gmra.mxu1 %vm72_vm0, %v66_v28 }
  0x4d   :  { %311 = vmatprep.mubr.f32.mxu0 %v847_v0  ;;  %407 = vmatprep.mubr.f32.mxu1 %v847_v0 }
  0x50   :  { %777 = vmatmul.mubr.msk.f32.gmra.mxu0 %vm72_vm0, %v51_v29  ;;  %793 = vmatmul.mubr.msk.f32.gmra.mxu1 %vm72_vm0, %v67_v30 }
  0x51   :  { %317 = vmatprep.mubr.f32.mxu0 %v847_v0  ;;  %413 = vmatprep.mubr.f32.mxu1 %v847_v0 }
  0x54   :  { %778 = vmatmul.mubr.msk.f32.gmra.mxu0 %vm72_vm0, %v52_v31  ;;  %794 = vmatmul.mubr.msk.f32.gmra.mxu1 %vm72_vm0, %v68_v32 }
  0x55   :  { %323 = vmatprep.mubr.f32.mxu0 %v847_v0  ;;  %419 = vmatprep.mubr.f32.mxu1 %v847_v0 }
  0x58   :  { %779 = vmatmul.mubr.msk.f32.gmra.mxu0 %vm72_vm0, %v53_v33  ;;  %795 = vmatmul.mubr.msk.f32.gmra.mxu1 %vm72_vm0, %v69_v34 }
  0xdc   :  { %v235_v42 = vpop.f32.mrf.mxu0  ;;  %v331_v43 = vpop.f32.mrf.mxu1 }
  0xdd   :  { %v438_v44 = vadd.f32 %v1034_v40, %v235_v42  ;;  %v566_v45 = vsub.f32 %v235_v42, %v1034_v40  ;;  %v470_v46 = vadd.f32 %v1034_v40, %v331_v43  ;;  %v598_v47 = vsub.f32 %v331_v43, %v1034_v40 }
  0xde   :  { %v237_v48 = vpop.f32.mrf.mxu0  ;;  %v333_v49 = vpop.f32.mrf.mxu1 }
  0xdf   :  { %vm502_vm1 = vcmp.ne.f32.partialorder %v438_v44, 0.0  ;;  %vm534_vm2 = vcmp.ne.f32.partialorder %v470_v46, 0.0  ;;  %v439_v50 = vadd.f32 %v1036_v41, %v237_v48  ;;  %v567_v51 = vsub.f32 %v237_v48, %v1036_v41 }
  0xe0   :  { %v630_v52 = vsel %vm502_vm1, %v566_v45, -0.1  ;;  %v662_v53 = vsel %vm534_vm2, %v598_v47, -0.1  ;;  %v471_v54 = vadd.f32 %v1036_v41, %v333_v49  ;;  %v599_v55 = vsub.f32 %v333_v49, %v1036_v41  ;;  %v241_v56 = vpop.f32.mrf.mxu0  ;;  %v337_v57 = vpop.f32.mrf.mxu1 }
  0xe1   :  { %694 = vst [vmem:[%s1361_s3] sm:$0xff] %v630_v52  ;;  %726 = vst [vmem:[%s1361_s3 + $0x100] sm:$0xff] %v662_v53  ;;  %vm503_vm3 = vcmp.ne.f32.partialorder %v439_v50, 0.0  ;;  %v440_v58 = vadd.f32 %v1034_v40, %v241_v56  ;;  %v568_v59 = vsub.f32 %v241_v56, %v1034_v40  ;;  %v472_v60 = vadd.f32 %v1034_v40, %v337_v57 }
  0xe2   :  { %v631_v61 = vsel %vm503_vm3, %v567_v51, -0.1  ;;  %vm535_vm4 = vcmp.ne.f32.partialorder %v471_v54, 0.0  ;;  %v600_v62 = vsub.f32 %v337_v57, %v1034_v40  ;;  %v243_v63 = vpop.f32.mrf.mxu0  ;;  %v339_v0 = vpop.f32.mrf.mxu1 }
  0xe3   :  { %695 = vst [vmem:[%s1361_s3 + $0x8] sm:$0xff] %v631_v61  ;;  %v663_v1 = vsel %vm535_vm4, %v599_v55, -0.1  ;;  %vm504_vm5 = vcmp.ne.f32.partialorder %v440_v58, 0.0  ;;  %vm536_vm6 = vcmp.ne.f32.partialorder %v472_v60, 0.0  ;;  %v441_v2 = vadd.f32 %v1036_v41, %v243_v63 }
  0xe4   :  { %727 = vst [vmem:[%s1361_s3 + $0x108] sm:$0xff] %v663_v1  ;;  %v632_v3 = vsel %vm504_vm5, %v568_v59, -0.1  ;;  %v664_v4 = vsel %vm536_vm6, %v600_v62, -0.1  ;;  %v569_v5 = vsub.f32 %v243_v63, %v1036_v41  ;;  %v473_v6 = vadd.f32 %v1036_v41, %v339_v0  ;;  %v247_v7 = vpop.f32.mrf.mxu0  ;;  %v343_v8 = vpop.f32.mrf.mxu1 }
  0xe5   :  { %696 = vst [vmem:[%s1361_s3 + $0x10] sm:$0xff] %v632_v3  ;;  %728 = vst [vmem:[%s1361_s3 + $0x110] sm:$0xff] %v664_v4  ;;  %vm505_vm7 = vcmp.ne.f32.partialorder %v441_v2, 0.0  ;;  %v601_v9 = vsub.f32 %v339_v0, %v1036_v41  ;;  %v442_v10 = vadd.f32 %v1034_v40, %v247_v7  ;;  %v570_v11 = vsub.f32 %v247_v7, %v1034_v40 }
  0xe6   :  { %v633_v12 = vsel %vm505_vm7, %v569_v5, -0.1  ;;  %vm537_vm8 = vcmp.ne.f32.partialorder %v473_v6, 0.0  ;;  %v474_v13 = vadd.f32 %v1034_v40, %v343_v8  ;;  %v602_v14 = vsub.f32 %v343_v8, %v1034_v40  ;;  %v249_v15 = vpop.f32.mrf.mxu0  ;;  %v345_v16 = vpop.f32.mrf.mxu1 }
  0xe7   :  { %697 = vst [vmem:[%s1361_s3 + $0x18] sm:$0xff] %v633_v12  ;;  %v665_v17 = vsel %vm537_vm8, %v601_v9, -0.1  ;;  %vm506_vm9 = vcmp.ne.f32.partialorder %v442_v10, 0.0  ;;  %v443_v18 = vadd.f32 %v1036_v41, %v249_v15  ;;  %v571_v19 = vsub.f32 %v249_v15, %v1036_v41 }
  0xe8   :  { %729 = vst [vmem:[%s1361_s3 + $0x118] sm:$0xff] %v665_v17  ;;  %v634_v20 = vsel %vm506_vm9, %v570_v11, -0.1  ;;  %vm538_vm10 = vcmp.ne.f32.partialorder %v474_v13, 0.0  ;;  %v475_v21 = vadd.f32 %v1036_v41, %v345_v16  ;;  %v603_v22 = vsub.f32 %v345_v16, %v1036_v41  ;;  %v253_v23 = vpop.f32.mrf.mxu0  ;;  %v349_v24 = vpop.f32.mrf.mxu1 }
  0xe9   :  { %698 = vst [vmem:[%s1361_s3 + $0x20] sm:$0xff] %v634_v20  ;;  %v666_v25 = vsel %vm538_vm10, %v602_v14, -0.1  ;;  %vm507_vm11 = vcmp.ne.f32.partialorder %v443_v18, 0.0  ;;  %v444_v26 = vadd.f32 %v1034_v40, %v253_v23  ;;  %v572_v27 = vsub.f32 %v253_v23, %v1034_v40 }
  0xea   :  { %730 = vst [vmem:[%s1361_s3 + $0x120] sm:$0xff] %v666_v25  ;;  %v635_v28 = vsel %vm507_vm11, %v571_v19, -0.1  ;;  %vm539_vm12 = vcmp.ne.f32.partialorder %v475_v21, 0.0  ;;  %v476_v29 = vadd.f32 %v1034_v40, %v349_v24  ;;  %v604_v30 = vsub.f32 %v349_v24, %v1034_v40  ;;  %v255_v31 = vpop.f32.mrf.mxu0  ;;  %v351_v32 = vpop.f32.mrf.mxu1 }
  0xeb   :  { %699 = vst [vmem:[%s1361_s3 + $0x28] sm:$0xff] %v635_v28  ;;  %v667_v33 = vsel %vm539_vm12, %v603_v22, -0.1  ;;  %vm508_vm13 = vcmp.ne.f32.partialorder %v444_v26, 0.0  ;;  %v445_v34 = vadd.f32 %v1036_v41, %v255_v31  ;;  %v573_v35 = vsub.f32 %v255_v31, %v1036_v41 }
  0xec   :  { %731 = vst [vmem:[%s1361_s3 + $0x128] sm:$0xff] %v667_v33  ;;  %v636_v36 = vsel %vm508_vm13, %v572_v27, -0.1  ;;  %vm540_vm14 = vcmp.ne.f32.partialorder %v476_v29, 0.0  ;;  %v477_v37 = vadd.f32 %v1036_v41, %v351_v32  ;;  %v605_v38 = vsub.f32 %v351_v32, %v1036_v41  ;;  %v259_v39 = vpop.f32.mrf.mxu0  ;;  %v355_v42 = vpop.f32.mrf.mxu1 }
  0xed   :  { %700 = vst [vmem:[%s1361_s3 + $0x30] sm:$0xff] %v636_v36  ;;  %v668_v43 = vsel %vm540_vm14, %v604_v30, -0.1  ;;  %vm509_vm15 = vcmp.ne.f32.partialorder %v445_v34, 0.0  ;;  %v446_v44 = vadd.f32 %v1034_v40, %v259_v39  ;;  %v574_v45 = vsub.f32 %v259_v39, %v1034_v40 }
  0xee   :  { %732 = vst [vmem:[%s1361_s3 + $0x130] sm:$0xff] %v668_v43  ;;  %v637_v46 = vsel %vm509_vm15, %v573_v35, -0.1  ;;  %vm541_vm0 = vcmp.ne.f32.partialorder %v477_v37, 0.0  ;;  %v478_v47 = vadd.f32 %v1034_v40, %v355_v42  ;;  %v606_v48 = vsub.f32 %v355_v42, %v1034_v40  ;;  %v261_v49 = vpop.f32.mrf.mxu0  ;;  %v357_v50 = vpop.f32.mrf.mxu1 }
  0xef   :  { %701 = vst [vmem:[%s1361_s3 + $0x38] sm:$0xff] %v637_v46  ;;  %v669_v51 = vsel %vm541_vm0, %v605_v38, -0.1  ;;  %vm510_vm1 = vcmp.ne.f32.partialorder %v446_v44, 0.0  ;;  %v447_v52 = vadd.f32 %v1036_v41, %v261_v49  ;;  %v575_v53 = vsub.f32 %v261_v49, %v1036_v41 }
  0xf0   :  { %733 = vst [vmem:[%s1361_s3 + $0x138] sm:$0xff] %v669_v51  ;;  %v638_v54 = vsel %vm510_vm1, %v574_v45, -0.1  ;;  %vm542_vm2 = vcmp.ne.f32.partialorder %v478_v47, 0.0  ;;  %v479_v55 = vadd.f32 %v1036_v41, %v357_v50  ;;  %v607_v56 = vsub.f32 %v357_v50, %v1036_v41  ;;  %v265_v57 = vpop.f32.mrf.mxu0  ;;  %v361_v58 = vpop.f32.mrf.mxu1 }
  0xf1   :  { %702 = vst [vmem:[%s1361_s3 + $0x40] sm:$0xff] %v638_v54  ;;  %v670_v59 = vsel %vm542_vm2, %v606_v48, -0.1  ;;  %vm511_vm3 = vcmp.ne.f32.partialorder %v447_v52, 0.0  ;;  %v448_v60 = vadd.f32 %v1034_v40, %v265_v57  ;;  %v576_v61 = vsub.f32 %v265_v57, %v1034_v40 }
  0xf2   :  { %734 = vst [vmem:[%s1361_s3 + $0x140] sm:$0xff] %v670_v59  ;;  %v639_v62 = vsel %vm511_vm3, %v575_v53, -0.1  ;;  %vm543_vm4 = vcmp.ne.f32.partialorder %v479_v55, 0.0  ;;  %v480_v63 = vadd.f32 %v1034_v40, %v361_v58  ;;  %v608_v0 = vsub.f32 %v361_v58, %v1034_v40  ;;  %v267_v1 = vpop.f32.mrf.mxu0  ;;  %v363_v2 = vpop.f32.mrf.mxu1 }
  0xf3   :  { %703 = vst [vmem:[%s1361_s3 + $0x48] sm:$0xff] %v639_v62  ;;  %v671_v3 = vsel %vm543_vm4, %v607_v56, -0.1  ;;  %vm512_vm5 = vcmp.ne.f32.partialorder %v448_v60, 0.0  ;;  %v449_v4 = vadd.f32 %v1036_v41, %v267_v1  ;;  %v577_v5 = vsub.f32 %v267_v1, %v1036_v41 }
  0xf4   :  { %735 = vst [vmem:[%s1361_s3 + $0x148] sm:$0xff] %v671_v3  ;;  %v640_v6 = vsel %vm512_vm5, %v576_v61, -0.1  ;;  %vm544_vm6 = vcmp.ne.f32.partialorder %v480_v63, 0.0  ;;  %v481_v7 = vadd.f32 %v1036_v41, %v363_v2  ;;  %v609_v8 = vsub.f32 %v363_v2, %v1036_v41  ;;  %v271_v9 = vpop.f32.mrf.mxu0  ;;  %v367_v10 = vpop.f32.mrf.mxu1 }
  0xf5   :  { %704 = vst [vmem:[%s1361_s3 + $0x50] sm:$0xff] %v640_v6  ;;  %v672_v11 = vsel %vm544_vm6, %v608_v0, -0.1  ;;  %vm513_vm7 = vcmp.ne.f32.partialorder %v449_v4, 0.0  ;;  %v450_v12 = vadd.f32 %v1034_v40, %v271_v9  ;;  %v578_v13 = vsub.f32 %v271_v9, %v1034_v40 }
  0xf6   :  { %736 = vst [vmem:[%s1361_s3 + $0x150] sm:$0xff] %v672_v11  ;;  %v641_v14 = vsel %vm513_vm7, %v577_v5, -0.1  ;;  %vm545_vm8 = vcmp.ne.f32.partialorder %v481_v7, 0.0  ;;  %v482_v15 = vadd.f32 %v1034_v40, %v367_v10  ;;  %v610_v16 = vsub.f32 %v367_v10, %v1034_v40  ;;  %v273_v17 = vpop.f32.mrf.mxu0  ;;  %v369_v18 = vpop.f32.mrf.mxu1 }
  0xf7   :  { %705 = vst [vmem:[%s1361_s3 + $0x58] sm:$0xff] %v641_v14  ;;  %v673_v19 = vsel %vm545_vm8, %v609_v8, -0.1  ;;  %vm514_vm9 = vcmp.ne.f32.partialorder %v450_v12, 0.0  ;;  %v451_v20 = vadd.f32 %v1036_v41, %v273_v17  ;;  %v579_v21 = vsub.f32 %v273_v17, %v1036_v41 }
  0xf8   :  { %737 = vst [vmem:[%s1361_s3 + $0x158] sm:$0xff] %v673_v19  ;;  %v642_v22 = vsel %vm514_vm9, %v578_v13, -0.1  ;;  %vm546_vm10 = vcmp.ne.f32.partialorder %v482_v15, 0.0  ;;  %v483_v23 = vadd.f32 %v1036_v41, %v369_v18  ;;  %v611_v24 = vsub.f32 %v369_v18, %v1036_v41  ;;  %v277_v25 = vpop.f32.mrf.mxu0  ;;  %v373_v26 = vpop.f32.mrf.mxu1 }
  0xf9   :  { %706 = vst [vmem:[%s1361_s3 + $0x60] sm:$0xff] %v642_v22  ;;  %v674_v27 = vsel %vm546_vm10, %v610_v16, -0.1  ;;  %vm515_vm11 = vcmp.ne.f32.partialorder %v451_v20, 0.0  ;;  %v452_v28 = vadd.f32 %v1034_v40, %v277_v25  ;;  %v580_v29 = vsub.f32 %v277_v25, %v1034_v40 }
  0xfa   :  { %738 = vst [vmem:[%s1361_s3 + $0x160] sm:$0xff] %v674_v27  ;;  %v643_v30 = vsel %vm515_vm11, %v579_v21, -0.1  ;;  %vm547_vm12 = vcmp.ne.f32.partialorder %v483_v23, 0.0  ;;  %v484_v31 = vadd.f32 %v1034_v40, %v373_v26  ;;  %v612_v32 = vsub.f32 %v373_v26, %v1034_v40  ;;  %v279_v33 = vpop.f32.mrf.mxu0  ;;  %v375_v34 = vpop.f32.mrf.mxu1 }
  0xfb   :  { %707 = vst [vmem:[%s1361_s3 + $0x68] sm:$0xff] %v643_v30  ;;  %v675_v35 = vsel %vm547_vm12, %v611_v24, -0.1  ;;  %vm516_vm13 = vcmp.ne.f32.partialorder %v452_v28, 0.0  ;;  %v453_v36 = vadd.f32 %v1036_v41, %v279_v33  ;;  %v581_v37 = vsub.f32 %v279_v33, %v1036_v41 }
  0xfc   :  { %739 = vst [vmem:[%s1361_s3 + $0x168] sm:$0xff] %v675_v35  ;;  %v644_v38 = vsel %vm516_vm13, %v580_v29, -0.1  ;;  %vm548_vm14 = vcmp.ne.f32.partialorder %v484_v31, 0.0  ;;  %v485_v39 = vadd.f32 %v1036_v41, %v375_v34  ;;  %v613_v42 = vsub.f32 %v375_v34, %v1036_v41  ;;  %v283_v43 = vpop.f32.mrf.mxu0  ;;  %v379_v44 = vpop.f32.mrf.mxu1 }
  0xfd   :  { %708 = vst [vmem:[%s1361_s3 + $0x70] sm:$0xff] %v644_v38  ;;  %v676_v45 = vsel %vm548_vm14, %v612_v32, -0.1  ;;  %vm517_vm15 = vcmp.ne.f32.partialorder %v453_v36, 0.0  ;;  %v454_v46 = vadd.f32 %v1034_v40, %v283_v43  ;;  %v582_v47 = vsub.f32 %v283_v43, %v1034_v40 }
  0xfe   :  { %740 = vst [vmem:[%s1361_s3 + $0x170] sm:$0xff] %v676_v45  ;;  %v645_v48 = vsel %vm517_vm15, %v581_v37, -0.1  ;;  %vm549_vm0 = vcmp.ne.f32.partialorder %v485_v39, 0.0  ;;  %v486_v49 = vadd.f32 %v1034_v40, %v379_v44  ;;  %v614_v50 = vsub.f32 %v379_v44, %v1034_v40  ;;  %v285_v51 = vpop.f32.mrf.mxu0  ;;  %v381_v52 = vpop.f32.mrf.mxu1 }
  0xff   :  { %709 = vst [vmem:[%s1361_s3 + $0x78] sm:$0xff] %v645_v48  ;;  %v677_v53 = vsel %vm549_vm0, %v613_v42, -0.1  ;;  %vm518_vm1 = vcmp.ne.f32.partialorder %v454_v46, 0.0  ;;  %v455_v54 = vadd.f32 %v1036_v41, %v285_v51  ;;  %v583_v55 = vsub.f32 %v285_v51, %v1036_v41 }
 0x100   :  { %741 = vst [vmem:[%s1361_s3 + $0x178] sm:$0xff] %v677_v53  ;;  %v646_v56 = vsel %vm518_vm1, %v582_v47, -0.1  ;;  %vm550_vm2 = vcmp.ne.f32.partialorder %v486_v49, 0.0  ;;  %v487_v57 = vadd.f32 %v1036_v41, %v381_v52  ;;  %v615_v58 = vsub.f32 %v381_v52, %v1036_v41  ;;  %v289_v59 = vpop.f32.mrf.mxu0  ;;  %v385_v60 = vpop.f32.mrf.mxu1 }
 0x101   :  { %710 = vst [vmem:[%s1361_s3 + $0x80] sm:$0xff] %v646_v56  ;;  %v678_v61 = vsel %vm550_vm2, %v614_v50, -0.1  ;;  %vm519_vm3 = vcmp.ne.f32.partialorder %v455_v54, 0.0  ;;  %v456_v62 = vadd.f32 %v1034_v40, %v289_v59  ;;  %v584_v63 = vsub.f32 %v289_v59, %v1034_v40 }
 0x102   :  { %742 = vst [vmem:[%s1361_s3 + $0x180] sm:$0xff] %v678_v61  ;;  %v647_v0 = vsel %vm519_vm3, %v583_v55, -0.1  ;;  %vm551_vm4 = vcmp.ne.f32.partialorder %v487_v57, 0.0  ;;  %v488_v1 = vadd.f32 %v1034_v40, %v385_v60  ;;  %v616_v2 = vsub.f32 %v385_v60, %v1034_v40  ;;  %v291_v3 = vpop.f32.mrf.mxu0  ;;  %v387_v4 = vpop.f32.mrf.mxu1 }
 0x103   :  { %711 = vst [vmem:[%s1361_s3 + $0x88] sm:$0xff] %v647_v0  ;;  %v679_v5 = vsel %vm551_vm4, %v615_v58, -0.1  ;;  %vm520_vm5 = vcmp.ne.f32.partialorder %v456_v62, 0.0  ;;  %v457_v6 = vadd.f32 %v1036_v41, %v291_v3  ;;  %v585_v7 = vsub.f32 %v291_v3, %v1036_v41 }
 0x104   :  { %743 = vst [vmem:[%s1361_s3 + $0x188] sm:$0xff] %v679_v5  ;;  %v648_v8 = vsel %vm520_vm5, %v584_v63, -0.1  ;;  %vm552_vm6 = vcmp.ne.f32.partialorder %v488_v1, 0.0  ;;  %v489_v9 = vadd.f32 %v1036_v41, %v387_v4  ;;  %v617_v10 = vsub.f32 %v387_v4, %v1036_v41  ;;  %v295_v11 = vpop.f32.mrf.mxu0  ;;  %v391_v12 = vpop.f32.mrf.mxu1 }
 0x105   :  { %712 = vst [vmem:[%s1361_s3 + $0x90] sm:$0xff] %v648_v8  ;;  %v680_v13 = vsel %vm552_vm6, %v616_v2, -0.1  ;;  %vm521_vm7 = vcmp.ne.f32.partialorder %v457_v6, 0.0  ;;  %v458_v14 = vadd.f32 %v1034_v40, %v295_v11  ;;  %v586_v15 = vsub.f32 %v295_v11, %v1034_v40 }
 0x106   :  { %744 = vst [vmem:[%s1361_s3 + $0x190] sm:$0xff] %v680_v13  ;;  %v649_v16 = vsel %vm521_vm7, %v585_v7, -0.1  ;;  %vm553_vm8 = vcmp.ne.f32.partialorder %v489_v9, 0.0  ;;  %v490_v17 = vadd.f32 %v1034_v40, %v391_v12  ;;  %v618_v18 = vsub.f32 %v391_v12, %v1034_v40  ;;  %v297_v19 = vpop.f32.mrf.mxu0  ;;  %v393_v20 = vpop.f32.mrf.mxu1 }
 0x107   :  { %713 = vst [vmem:[%s1361_s3 + $0x98] sm:$0xff] %v649_v16  ;;  %v681_v21 = vsel %vm553_vm8, %v617_v10, -0.1  ;;  %vm522_vm9 = vcmp.ne.f32.partialorder %v458_v14, 0.0  ;;  %v459_v22 = vadd.f32 %v1036_v41, %v297_v19  ;;  %v587_v23 = vsub.f32 %v297_v19, %v1036_v41 }
 0x108   :  { %745 = vst [vmem:[%s1361_s3 + $0x198] sm:$0xff] %v681_v21  ;;  %v650_v24 = vsel %vm522_vm9, %v586_v15, -0.1  ;;  %vm554_vm10 = vcmp.ne.f32.partialorder %v490_v17, 0.0  ;;  %v491_v25 = vadd.f32 %v1036_v41, %v393_v20  ;;  %v619_v26 = vsub.f32 %v393_v20, %v1036_v41  ;;  %v301_v27 = vpop.f32.mrf.mxu0  ;;  %v397_v28 = vpop.f32.mrf.mxu1 }
 0x109   :  { %714 = vst [vmem:[%s1361_s3 + $0xa0] sm:$0xff] %v650_v24  ;;  %v682_v29 = vsel %vm554_vm10, %v618_v18, -0.1  ;;  %vm523_vm11 = vcmp.ne.f32.partialorder %v459_v22, 0.0  ;;  %v460_v30 = vadd.f32 %v1034_v40, %v301_v27  ;;  %v588_v31 = vsub.f32 %v301_v27, %v1034_v40 }
 0x10a   :  { %746 = vst [vmem:[%s1361_s3 + $0x1a0] sm:$0xff] %v682_v29  ;;  %v651_v32 = vsel %vm523_vm11, %v587_v23, -0.1  ;;  %vm555_vm12 = vcmp.ne.f32.partialorder %v491_v25, 0.0  ;;  %v492_v33 = vadd.f32 %v1034_v40, %v397_v28  ;;  %v620_v34 = vsub.f32 %v397_v28, %v1034_v40  ;;  %v303_v35 = vpop.f32.mrf.mxu0  ;;  %v399_v36 = vpop.f32.mrf.mxu1 }
 0x10b   :  { %715 = vst [vmem:[%s1361_s3 + $0xa8] sm:$0xff] %v651_v32  ;;  %v683_v37 = vsel %vm555_vm12, %v619_v26, -0.1  ;;  %vm524_vm13 = vcmp.ne.f32.partialorder %v460_v30, 0.0  ;;  %v461_v38 = vadd.f32 %v1036_v41, %v303_v35  ;;  %v589_v39 = vsub.f32 %v303_v35, %v1036_v41 }
 0x10c   :  { %747 = vst [vmem:[%s1361_s3 + $0x1a8] sm:$0xff] %v683_v37  ;;  %v652_v42 = vsel %vm524_vm13, %v588_v31, -0.1  ;;  %vm556_vm14 = vcmp.ne.f32.partialorder %v492_v33, 0.0  ;;  %v493_v43 = vadd.f32 %v1036_v41, %v399_v36  ;;  %v621_v44 = vsub.f32 %v399_v36, %v1036_v41  ;;  %v307_v45 = vpop.f32.mrf.mxu0  ;;  %v403_v46 = vpop.f32.mrf.mxu1 }
 0x10d   :  { %716 = vst [vmem:[%s1361_s3 + $0xb0] sm:$0xff] %v652_v42  ;;  %v684_v47 = vsel %vm556_vm14, %v620_v34, -0.1  ;;  %vm525_vm15 = vcmp.ne.f32.partialorder %v461_v38, 0.0  ;;  %v462_v48 = vadd.f32 %v1034_v40, %v307_v45  ;;  %v590_v49 = vsub.f32 %v307_v45, %v1034_v40 }
 0x10e   :  { %748 = vst [vmem:[%s1361_s3 + $0x1b0] sm:$0xff] %v684_v47  ;;  %v653_v50 = vsel %vm525_vm15, %v589_v39, -0.1  ;;  %vm557_vm0 = vcmp.ne.f32.partialorder %v493_v43, 0.0  ;;  %v494_v51 = vadd.f32 %v1034_v40, %v403_v46  ;;  %v622_v52 = vsub.f32 %v403_v46, %v1034_v40  ;;  %v309_v53 = vpop.f32.mrf.mxu0  ;;  %v405_v54 = vpop.f32.mrf.mxu1 }
 0x10f   :  { %717 = vst [vmem:[%s1361_s3 + $0xb8] sm:$0xff] %v653_v50  ;;  %v685_v55 = vsel %vm557_vm0, %v621_v44, -0.1  ;;  %vm526_vm1 = vcmp.ne.f32.partialorder %v462_v48, 0.0  ;;  %v463_v56 = vadd.f32 %v1036_v41, %v309_v53  ;;  %v591_v57 = vsub.f32 %v309_v53, %v1036_v41 }
 0x110   :  { %749 = vst [vmem:[%s1361_s3 + $0x1b8] sm:$0xff] %v685_v55  ;;  %v654_v58 = vsel %vm526_vm1, %v590_v49, -0.1  ;;  %vm558_vm2 = vcmp.ne.f32.partialorder %v494_v51, 0.0  ;;  %v495_v59 = vadd.f32 %v1036_v41, %v405_v54  ;;  %v623_v60 = vsub.f32 %v405_v54, %v1036_v41  ;;  %v313_v61 = vpop.f32.mrf.mxu0  ;;  %v409_v62 = vpop.f32.mrf.mxu1 }
 0x111   :  { %718 = vst [vmem:[%s1361_s3 + $0xc0] sm:$0xff] %v654_v58  ;;  %v686_v63 = vsel %vm558_vm2, %v622_v52, -0.1  ;;  %vm527_vm3 = vcmp.ne.f32.partialorder %v463_v56, 0.0  ;;  %v464_v0 = vadd.f32 %v1034_v40, %v313_v61  ;;  %v592_v1 = vsub.f32 %v313_v61, %v1034_v40 }
 0x112   :  { %750 = vst [vmem:[%s1361_s3 + $0x1c0] sm:$0xff] %v686_v63  ;;  %v655_v2 = vsel %vm527_vm3, %v591_v57, -0.1  ;;  %vm559_vm4 = vcmp.ne.f32.partialorder %v495_v59, 0.0  ;;  %v496_v3 = vadd.f32 %v1034_v40, %v409_v62  ;;  %v624_v4 = vsub.f32 %v409_v62, %v1034_v40  ;;  %v315_v5 = vpop.f32.mrf.mxu0  ;;  %v411_v6 = vpop.f32.mrf.mxu1 }
 0x113   :  { %719 = vst [vmem:[%s1361_s3 + $0xc8] sm:$0xff] %v655_v2  ;;  %v687_v7 = vsel %vm559_vm4, %v623_v60, -0.1  ;;  %vm528_vm5 = vcmp.ne.f32.partialorder %v464_v0, 0.0  ;;  %v465_v8 = vadd.f32 %v1036_v41, %v315_v5  ;;  %v593_v9 = vsub.f32 %v315_v5, %v1036_v41 }
 0x114   :  { %751 = vst [vmem:[%s1361_s3 + $0x1c8] sm:$0xff] %v687_v7  ;;  %v656_v10 = vsel %vm528_vm5, %v592_v1, -0.1  ;;  %vm560_vm6 = vcmp.ne.f32.partialorder %v496_v3, 0.0  ;;  %v497_v11 = vadd.f32 %v1036_v41, %v411_v6  ;;  %v625_v12 = vsub.f32 %v411_v6, %v1036_v41  ;;  %v319_v13 = vpop.f32.mrf.mxu0  ;;  %v415_v14 = vpop.f32.mrf.mxu1 }
 0x115   :  { %720 = vst [vmem:[%s1361_s3 + $0xd0] sm:$0xff] %v656_v10  ;;  %v688_v15 = vsel %vm560_vm6, %v624_v4, -0.1  ;;  %vm529_vm7 = vcmp.ne.f32.partialorder %v465_v8, 0.0  ;;  %v466_v16 = vadd.f32 %v1034_v40, %v319_v13  ;;  %v594_v17 = vsub.f32 %v319_v13, %v1034_v40 }
 0x116   :  { %752 = vst [vmem:[%s1361_s3 + $0x1d0] sm:$0xff] %v688_v15  ;;  %v657_v18 = vsel %vm529_vm7, %v593_v9, -0.1  ;;  %vm561_vm8 = vcmp.ne.f32.partialorder %v497_v11, 0.0  ;;  %v498_v19 = vadd.f32 %v1034_v40, %v415_v14  ;;  %v626_v20 = vsub.f32 %v415_v14, %v1034_v40  ;;  %v321_v21 = vpop.f32.mrf.mxu0  ;;  %v417_v22 = vpop.f32.mrf.mxu1 }
 0x117   :  { %721 = vst [vmem:[%s1361_s3 + $0xd8] sm:$0xff] %v657_v18  ;;  %v689_v23 = vsel %vm561_vm8, %v625_v12, -0.1  ;;  %vm530_vm9 = vcmp.ne.f32.partialorder %v466_v16, 0.0  ;;  %v467_v24 = vadd.f32 %v1036_v41, %v321_v21  ;;  %v595_v25 = vsub.f32 %v321_v21, %v1036_v41 }
 0x118   :  { %753 = vst [vmem:[%s1361_s3 + $0x1d8] sm:$0xff] %v689_v23  ;;  %v658_v26 = vsel %vm530_vm9, %v594_v17, -0.1  ;;  %vm562_vm10 = vcmp.ne.f32.partialorder %v498_v19, 0.0  ;;  %v499_v27 = vadd.f32 %v1036_v41, %v417_v22  ;;  %v627_v28 = vsub.f32 %v417_v22, %v1036_v41  ;;  %v325_v29 = vpop.f32.mrf.mxu0  ;;  %v421_v30 = vpop.f32.mrf.mxu1 }
 0x119   :  { %722 = vst [vmem:[%s1361_s3 + $0xe0] sm:$0xff] %v658_v26  ;;  %v690_v31 = vsel %vm562_vm10, %v626_v20, -0.1  ;;  %vm531_vm11 = vcmp.ne.f32.partialorder %v467_v24, 0.0  ;;  %v468_v32 = vadd.f32 %v1034_v40, %v325_v29  ;;  %v596_v33 = vsub.f32 %v325_v29, %v1034_v40 }
 0x11a   :  { %754 = vst [vmem:[%s1361_s3 + $0x1e0] sm:$0xff] %v690_v31  ;;  %v659_v34 = vsel %vm531_vm11, %v595_v25, -0.1  ;;  %vm563_vm12 = vcmp.ne.f32.partialorder %v499_v27, 0.0  ;;  %v500_v35 = vadd.f32 %v1034_v40, %v421_v30  ;;  %v628_v36 = vsub.f32 %v421_v30, %v1034_v40  ;;  %v327_v37 = vpop.f32.mrf.mxu0  ;;  %v423_v38 = vpop.f32.mrf.mxu1 }
 0x11b   :  { %723 = vst [vmem:[%s1361_s3 + $0xe8] sm:$0xff] %v659_v34  ;;  %v691_v39 = vsel %vm563_vm12, %v627_v28, -0.1  ;;  %vm532_vm13 = vcmp.ne.f32.partialorder %v468_v32, 0.0  ;;  %v469_v42 = vadd.f32 %v1036_v41, %v327_v37  ;;  %v597_v43 = vsub.f32 %v327_v37, %v1036_v41 }
 0x11c   :  { %755 = vst [vmem:[%s1361_s3 + $0x1e8] sm:$0xff] %v691_v39  ;;  %v660_v44 = vsel %vm532_vm13, %v596_v33, -0.1  ;;  %vm564_vm14 = vcmp.ne.f32.partialorder %v500_v35, 0.0  ;;  %v501_v40 = vadd.f32 %v1036_v41, %v423_v38  ;;  %v629_v45 = vsub.f32 %v423_v38, %v1036_v41 }
 0x11d   :  { %724 = vst [vmem:[%s1361_s3 + $0xf0] sm:$0xff] %v660_v44  ;;  %v692_v46 = vsel %vm564_vm14, %v628_v36, -0.1  ;;  %vm533_vm15 = vcmp.ne.f32.partialorder %v469_v42, 0.0 }
 0x11e   :  { %756 = vst [vmem:[%s1361_s3 + $0x1f0] sm:$0xff] %v692_v46  ;;  %v661_v47 = vsel %vm533_vm15, %v597_v43, -0.1  ;;  %vm565_vm0 = vcmp.ne.f32.partialorder %v501_v40, 0.0 }
 0x11f   :  { %725 = vst [vmem:[%s1361_s3 + $0xf8] sm:$0xff] %v661_v47  ;;  %v693_v48 = vsel %vm565_vm0, %v629_v45, -0.1 }
 0x120   :  { %757 = vst [vmem:[%s1361_s3 + $0x1f8] sm:$0xff] %v693_v48 }
 0x121   :  { %762 = vsyncpa [#allocation3], 1 }
 0x122   :  { %763 = vsyncpa [#allocation5], 1 }

</bundles_post_ra>
